<compile_context>
chip_gen: v7x
topology: tpu7x:2x2x1
jax: 0.10.0
libtpu: 0.0.40
codegen_flags: <defaults>
</compile_context>

<pallas_src>
import jax
import jax.numpy as jnp
from jax.experimental import pallas as pl
from jax.experimental.pallas import tpu as pltpu


def _null_kernel(x_ref, o_ref):
    # Identity copy of the current tile.  Keep the body a single ref-to-ref
    # assignment (no extra VALU work; v5e has only one vector-store slot).
    o_ref[...] = x_ref[...]


def null_forward(x):
    """`Null.forward`: a true no-op. Zero HBM traffic, zero kernel launches."""
    return x


def null_forward_pallas(x):
    """Identity via an explicit Pallas tiled copy (only when a kernel launch is
    mandated).  Tiles are <= 4 MiB each (16 MiB total with double-buffered
    in+out), so they fit v7x's 32 MiB scoped-VMEM default while large enough
    (>= 512 lanes/rows where possible) to sit near the HBM copy roofline."""
    if x.size == 0:
        return x

    orig_shape = x.shape

    # Flatten to 2D (rows, lanes).  For a contiguous row-major array this is a
    # free bitcast in XLA -- unlike the previous pad/slice pair, it adds no
    # extra HBM passes.
    if x.ndim == 0:
        x2 = x.reshape(1, 1)
    elif x.ndim == 1:
        x2 = x.reshape(1, x.shape[0])
    else:
        x2 = x.reshape(-1, x.shape[-1])
    R, C = x2.shape

    itemsize = jnp.dtype(x.dtype).itemsize
    # Native sublane count per dtype: 8 for 4-byte, 16 for 2-byte, 32 for 1-byte.
    sublane = max(8, 32 // max(1, itemsize))
    target_tile_bytes = 4 * 1024 * 1024  # 4 MiB per tile

    # Lane (last) dim: full extent (always legal) or a multiple of 128 with the
    # partial edge tile handled by the cdiv grid.
    if C <= 2048:
        tc = C
    else:
        tc = 2048  # multiple of 128

    # Sublane (row) dim: full extent, or a dtype-aligned multiple capped so the
    # tile stays <= target_tile_bytes.  No full-extent fallback for huge R, so
    # VMEM can never be blown by a non-divisible input.
    max_tr = max(sublane, (target_tile_bytes // (tc * itemsize)) // sublane * sublane)
    tr = R if R <= max_tr else max_tr

    grid = (pl.cdiv(R, tr), pl.cdiv(C, tc))

    out = pl.pallas_call(
        _null_kernel,
        out_shape=jax.ShapeDtypeStruct((R, C), x.dtype),
        grid_spec=pltpu.PrefetchScalarGridSpec(
            num_scalar_prefetch=0,
            grid=grid,
            in_specs=[pl.BlockSpec((tr, tc), lambda i, j: (i, j))],
            out_specs=pl.BlockSpec((tr, tc), lambda i, j: (i, j)),
        ),
        compiler_params=pltpu.CompilerParams(
            # Both axes independent -> work shards across the 2 TensorCores on
            # v7x; neutral on single-TC v5e/v6e.
            dimension_semantics=("parallel", "parallel"),
            # 4 MiB tiles x 2 buffers x (in + out) = 16 MiB; explicit limit
            # stays well inside v7x's 64 MiB physical VMEM.
            vmem_limit_bytes=32 * 1024 * 1024,
        ),
    )(x2)

    return out.reshape(orig_shape)


if __name__ == "__main__":
    key = jax.random.PRNGKey(0)
    # Conv-style NCHW input consistent with the LaneGCN layer conventions.
    x = jax.random.normal(key, (2, 4, 16, 16), dtype=jnp.float32)

    # Recommended production path: true no-op identity.
    y0 = null_forward(x)
    assert y0 is x

    # Pallas kernel path (for frameworks that require a kernel launch).
    y = null_forward_pallas(x)
    y = jax.block_until_ready(y)

    assert y.shape == x.shape, (y.shape, x.shape)
    assert y.dtype == x.dtype, (y.dtype, x.dtype)
    assert bool(jnp.all(y == x)), "identity mismatch"

    print("KERNEL_OK")
</pallas_src>

<mosaic_0001>
module attributes {stable_mosaic.version = 11 : i64} {
  func.func @_null_kernel(%arg0: i32, %arg1: i32, %arg2: memref<128x16xf32, #tpu.memory_space<vmem>>, %arg3: memref<128x16xf32, #tpu.memory_space<vmem>>) attributes {dimension_semantics = [#tpu.dimension_semantics<parallel>, #tpu.dimension_semantics<parallel>], iteration_bounds = array<i64: 1, 1>, scalar_prefetch = 0 : i64, scratch_operands = 0 : i64, tpu.core_type = #tpu.core_type<tc>, window_params = [{transform_indices = @transform_0, window_bounds = array<i64: 128, 16>}, {transform_indices = @transform_1, window_bounds = array<i64: 128, 16>}]} {
    %c0 = arith.constant 0 : index
    %c0_0 = arith.constant 0 : index
    %0 = vector.load %arg2[%c0, %c0_0] : memref<128x16xf32, #tpu.memory_space<vmem>>, vector<128x16xf32>
    %c0_1 = arith.constant 0 : index
    %c0_2 = arith.constant 0 : index
    %1 = vector.load %arg3[%c0_1, %c0_2] : memref<128x16xf32, #tpu.memory_space<vmem>>, vector<128x16xf32>
    tpu.vector_store %arg3[%c0_1, %c0_2], %0 {strides = array<i32>} : memref<128x16xf32, #tpu.memory_space<vmem>>, vector<128x16xf32>,
    return
  }
  func.func @transform_0(%arg0: i32, %arg1: i32) -> (i32, i32) {
    %c0_i32 = arith.constant 0 : i32
    return %arg0, %arg1 : i32, i32
  }
  func.func @transform_1(%arg0: i32, %arg1: i32) -> (i32, i32) {
    %c0_i32 = arith.constant 0 : i32
    return %arg0, %arg1 : i32, i32
  }
}

</mosaic_0001>

<bundles_post_ra>
// kernel: tpu_custom_call.1
= control target key start
LH: loop header
LB: loop body
LE: loop exit
PB: predicated region body
PF: predicated region fallthrough
CT: control target
= control target key end

     0   :  { %vm24_vm0 = vcmask 130048   ;;  %s167_s0 = inlined_call_operand.vmem [shape: f32[128,16], index: 0, kind: input, shape index: {}]   ;;  %s168_s1 = inlined_call_operand.vmem [shape: f32[128,16], index: 1, kind: output, shape index: {}]  }
   0x1   :  { %v8_v0 = vld [vmem:[%s167_s0] sm:$0xff]  ;;  %v9_v1 = vld [vmem:[%s167_s0 + $0x8] sm:$0xff]  ;;  %v10_v2 = vld [vmem:[%s167_s0 + $0x10] sm:$0xff] }
   0x2   :  { %25 = vst.msk [vmem:[%s168_s1] sm:$0xff] %vm24_vm0, %v8_v0  ;;  %26 = vst.msk [vmem:[%s168_s1 + $0x8] sm:$0xff] %vm24_vm0, %v9_v1  ;;  %v11_v3 = vld [vmem:[%s167_s0 + $0x18] sm:$0xff]  ;;  %v12_v4 = vld [vmem:[%s167_s0 + $0x20] sm:$0xff] }
   0x3   :  { %27 = vst.msk [vmem:[%s168_s1 + $0x10] sm:$0xff] %vm24_vm0, %v10_v2  ;;  %v13_v5 = vld [vmem:[%s167_s0 + $0x28] sm:$0xff]  ;;  %28 = vst.msk [vmem:[%s168_s1 + $0x18] sm:$0xff] %vm24_vm0, %v11_v3  ;;  %v14_v6 = vld [vmem:[%s167_s0 + $0x30] sm:$0xff] }
   0x4   :  { %29 = vst.msk [vmem:[%s168_s1 + $0x20] sm:$0xff] %vm24_vm0, %v12_v4  ;;  %30 = vst.msk [vmem:[%s168_s1 + $0x28] sm:$0xff] %vm24_vm0, %v13_v5  ;;  %v15_v7 = vld [vmem:[%s167_s0 + $0x38] sm:$0xff]  ;;  %v16_v8 = vld [vmem:[%s167_s0 + $0x40] sm:$0xff] }
   0x5   :  { %31 = vst.msk [vmem:[%s168_s1 + $0x30] sm:$0xff] %vm24_vm0, %v14_v6  ;;  %32 = vst.msk [vmem:[%s168_s1 + $0x38] sm:$0xff] %vm24_vm0, %v15_v7  ;;  %v17_v9 = vld [vmem:[%s167_s0 + $0x48] sm:$0xff]  ;;  %v18_v10 = vld [vmem:[%s167_s0 + $0x50] sm:$0xff] }
   0x6   :  { %33 = vst.msk [vmem:[%s168_s1 + $0x40] sm:$0xff] %vm24_vm0, %v16_v8  ;;  %v19_v11 = vld [vmem:[%s167_s0 + $0x58] sm:$0xff]  ;;  %34 = vst.msk [vmem:[%s168_s1 + $0x48] sm:$0xff] %vm24_vm0, %v17_v9  ;;  %v20_v12 = vld [vmem:[%s167_s0 + $0x60] sm:$0xff] }
   0x7   :  { %35 = vst.msk [vmem:[%s168_s1 + $0x50] sm:$0xff] %vm24_vm0, %v18_v10  ;;  %36 = vst.msk [vmem:[%s168_s1 + $0x58] sm:$0xff] %vm24_vm0, %v19_v11  ;;  %v21_v13 = vld [vmem:[%s167_s0 + $0x68] sm:$0xff]  ;;  %v22_v14 = vld [vmem:[%s167_s0 + $0x70] sm:$0xff] }
   0x8   :  { %37 = vst.msk [vmem:[%s168_s1 + $0x60] sm:$0xff] %vm24_vm0, %v20_v12  ;;  %38 = vst.msk [vmem:[%s168_s1 + $0x68] sm:$0xff] %vm24_vm0, %v21_v13  ;;  %v23_v15 = vld [vmem:[%s167_s0 + $0x78] sm:$0xff] }
   0x9   :  { %39 = vst.msk [vmem:[%s168_s1 + $0x70] sm:$0xff] %vm24_vm0, %v22_v14  ;;  %40 = vst.msk [vmem:[%s168_s1 + $0x78] sm:$0xff] %vm24_vm0, %v23_v15 }

</bundles_post_ra>
